<compile_context>
chip_gen: v5e
topology: v5e:2x2
jax: 0.10.0
libtpu: 0.0.40
codegen_flags: <defaults>
</compile_context>

<pallas_src>
import functools

import jax
import jax.numpy as jnp
from jax.experimental import pallas as pl
from jax.experimental.pallas import tpu as pltpu


def _round_up(v, m):
    return ((v + m - 1) // m) * m


def _sublane_multiple(dtype):
    # f32 -> 8, bf16 -> 16, int8/fp8 -> 32 (sublane packing).
    return max(8, 32 // jnp.dtype(dtype).itemsize)


def _pick_tile(aligned, cap, unit=128, min_blocks=1):
    """Largest multiple of `unit` dividing `aligned`, <= cap, leaving at least
    `min_blocks` blocks when possible. `aligned` is a positive multiple of unit."""
    limit = min(cap, aligned)
    if aligned >= min_blocks * unit:
        limit = min(limit, aligned // min_blocks)
    best = unit
    for t in range(unit, limit + 1, unit):
        if aligned % t == 0:
            best = t
    return best


def prepare_slpnet_weight(weight, *, dtype=None, tn_cap=512, tk_cap=1024):
    """One-time (model-init) weight preparation, off the forward hot path.

    weight: (OUT, IN) PyTorch nn.Linear layout.
    Returns dict with the transposed + 128-aligned (Kp, Np) weight and tiling.
    """
    OUT, IN = weight.shape
    if dtype is not None:
        weight = weight.astype(dtype)
    n_aligned = _round_up(OUT, 128)
    k_aligned = _round_up(IN, 128)
    # >= 2 N blocks when OUT allows: at small batch N is the only grid axis
    # that can shard across v7x's two TensorCores.
    tn = _pick_tile(n_aligned, tn_cap, min_blocks=2)
    tk = _pick_tile(k_aligned, tk_cap, min_blocks=1)
    wT = weight.T  # (IN, OUT): plain (M,K)x(K,N) dot in-kernel, no NT form.
    if (k_aligned, n_aligned) != (IN, OUT):
        wT = jnp.pad(wT, ((0, k_aligned - IN), (0, n_aligned - OUT)))
    return {"w": wT, "out_features": OUT, "in_features": IN, "tn": tn, "tk": tk}


# ---------------- kernels ----------------


def _linear_kernel_single_k(x_ref, w_ref, o_ref):
    # One K tile covers all of IN: no accumulator, no zero-init, direct store.
    o_ref[...] = jnp.dot(
        x_ref[...], w_ref[...], preferred_element_type=jnp.float32
    ).astype(o_ref.dtype)


def _linear_kernel_xres(x_ref, w_ref, o_ref, acc_ref, *, tk):
    # x row-block resident across the whole K axis; slice the current K band.
    k = pl.program_id(2)

    @pl.when(k == 0)
    def _():
        acc_ref[...] = jnp.zeros_like(acc_ref)

    start = pl.multiple_of(k * tk, tk)
    acc_ref[...] += jnp.dot(
        x_ref[:, pl.ds(start, tk)], w_ref[...], preferred_element_type=jnp.float32
    )

    @pl.when(k == pl.num_programs(2) - 1)
    def _():
        o_ref[...] = acc_ref[...].astype(o_ref.dtype)


def _linear_kernel_tiled(x_ref, w_ref, o_ref, acc_ref):
    k = pl.program_id(2)

    @pl.when(k == 0)
    def _():
        acc_ref[...] = jnp.zeros_like(acc_ref)

    acc_ref[...] += jnp.dot(
        x_ref[...], w_ref[...], preferred_element_type=jnp.float32
    )

    @pl.when(k == pl.num_programs(2) - 1)
    def _():
        o_ref[...] = acc_ref[...].astype(o_ref.dtype)


# ---------------- forward ----------------

_X_RESIDENT_BUDGET = 4 * 1024 * 1024  # per-buffer bytes for keeping x's K in VMEM


def slpnet_forward(x, prepared, *, tm_cap=256):
    """x: (B, IN); prepared: output of prepare_slpnet_weight. Returns (B, OUT)."""
    w = prepared["w"]
    IN = prepared["in_features"]
    OUT = prepared["out_features"]
    tn = prepared["tn"]
    tk = prepared["tk"]
    Kp, Np = w.shape

    B, IN_x = x.shape
    assert IN_x == IN, "input_size mismatch"
    out_dtype = x.dtype

    if x.dtype != w.dtype:
        x = x.astype(w.dtype)

    sub = _sublane_multiple(x.dtype)
    tm = min(tm_cap, _round_up(B, sub))
    Mp = _round_up(B, tm)

    if (Mp, Kp) != (B, IN):
        # Zero K tail: padded columns contribute nothing to the dot.
        x = jnp.pad(x, ((0, Mp - B), (0, Kp - IN)))

    gm, gn, gk = Mp // tm, Np // tn, Kp // tk
    itemsize = jnp.dtype(w.dtype).itemsize

    if gk == 1:
        kernel = _linear_kernel_single_k
        grid = (gm, gn)
        in_specs = [
            pl.BlockSpec((tm, Kp), lambda i, j: (i, 0)),
            pl.BlockSpec((Kp, tn), lambda i, j: (0, j)),
        ]
        out_spec = pl.BlockSpec((tm, tn), lambda i, j: (i, j))
        scratch = []
        semantics = ("parallel", "parallel")
        x_blk_bytes = tm * Kp * itemsize
    else:
        x_resident = tm * Kp * itemsize <= _X_RESIDENT_BUDGET
        if x_resident:
            kernel = functools.partial(_linear_kernel_xres, tk=tk)
            x_spec = pl.BlockSpec((tm, Kp), lambda i, j, k: (i, 0))
            x_blk_bytes = tm * Kp * itemsize
        else:
            kernel = _linear_kernel_tiled
            x_spec = pl.BlockSpec((tm, tk), lambda i, j, k: (i, k))
            x_blk_bytes = tm * tk * itemsize
        grid = (gm, gn, gk)
        in_specs = [x_spec, pl.BlockSpec((tk, tn), lambda i, j, k: (k, j))]
        out_spec = pl.BlockSpec((tm, tn), lambda i, j, k: (i, j))
        scratch = [pltpu.VMEM((tm, tn), jnp.float32)]
        semantics = ("parallel", "parallel", "arbitrary")

    w_blk_bytes = tk * tn * itemsize
    o_blk_bytes = tm * tn * jnp.dtype(out_dtype).itemsize
    acc_bytes = tm * tn * 4 if gk > 1 else 0
    footprint = 2 * (x_blk_bytes + w_blk_bytes + o_blk_bytes) + acc_bytes
    # v5e scoped-VMEM default is only 16 MiB -> raise explicitly; keep well
    # under v7x's 64 MiB physical per TensorCore.
    vmem_limit = int(min(max(32 * 1024 * 1024, 2 * footprint), 48 * 1024 * 1024))

    cost = pl.CostEstimate(
        flops=2 * Mp * Np * Kp,
        transcendentals=0,
        bytes_accessed=(Mp * Kp + Kp * Np) * itemsize
        + Mp * Np * jnp.dtype(out_dtype).itemsize,
    )

    out_p = pl.pallas_call(
        kernel,
        out_shape=jax.ShapeDtypeStruct((Mp, Np), out_dtype),
        grid_spec=pltpu.PrefetchScalarGridSpec(
            num_scalar_prefetch=0,
            grid=grid,
            in_specs=in_specs,
            out_specs=out_spec,
            scratch_shapes=scratch,
        ),
        compiler_params=pltpu.CompilerParams(
            dimension_semantics=semantics,
            vmem_limit_bytes=vmem_limit,
        ),
        cost_estimate=cost,
    )(x, w)

    if (Mp, Np) != (B, OUT):
        out_p = out_p[:B, :OUT]
    return out_p


if __name__ == "__main__":
    key = jax.random.PRNGKey(0)
    k_x, k_w, k_x2, k_w2 = jax.random.split(key, 4)

    # SLPNet(input_size=32, output_size=16), batch=8 -> single-K fast path.
    B, IN, OUT = 8, 32, 16
    x = jax.random.normal(k_x, (B, IN), dtype=jnp.float32)
    weight = jax.random.normal(k_w, (OUT, IN), dtype=jnp.float32)  # N(0,1), (out,in)
    params = prepare_slpnet_weight(weight)
    out = jax.block_until_ready(slpnet_forward(x, params))
    ref = x @ weight.T
    assert out.shape == (B, OUT)
    assert jnp.allclose(out, ref, atol=1e-5, rtol=1e-5)

    # Ragged, multi-K-tile exercise of the accumulator / x-resident path.
    B2, IN2, OUT2 = 10, 300, 200
    x2 = jax.random.normal(k_x2, (B2, IN2), dtype=jnp.float32)
    w2 = jax.random.normal(k_w2, (OUT2, IN2), dtype=jnp.float32)
    params2 = prepare_slpnet_weight(w2, tk_cap=128)  # force >1 K step
    out2 = jax.block_until_ready(slpnet_forward(x2, params2))
    ref2 = x2 @ w2.T
    assert out2.shape == (B2, OUT2)
    assert jnp.allclose(out2, ref2, atol=1e-4, rtol=1e-4)

    print("KERNEL_OK")
</pallas_src>

<mosaic_0001>
module attributes {stable_mosaic.version = 11 : i64} {
  func.func @_linear_kernel_single_k(%arg0: i32, %arg1: i32, %arg2: memref<8x128xf32, #tpu.memory_space<vmem>>, %arg3: memref<128x128xf32, #tpu.memory_space<vmem>>, %arg4: memref<8x128xf32, #tpu.memory_space<vmem>>) attributes {dimension_semantics = [#tpu.dimension_semantics<parallel>, #tpu.dimension_semantics<parallel>], iteration_bounds = array<i64: 1, 1>, scalar_prefetch = 0 : i64, scratch_operands = 0 : i64, tpu.core_type = #tpu.core_type<tc>, window_params = [{transform_indices = @transform_0, window_bounds = array<i64: 8, 128>}, {transform_indices = @transform_1, window_bounds = array<i64: 128, 128>}, {transform_indices = @transform_2, window_bounds = array<i64: 8, 128>}]} {
    %c0 = arith.constant 0 : index
    %c0_0 = arith.constant 0 : index
    %0 = vector.load %arg2[%c0, %c0_0] : memref<8x128xf32, #tpu.memory_space<vmem>>, vector<8x128xf32>
    %c0_1 = arith.constant 0 : index
    %c0_2 = arith.constant 0 : index
    %1 = vector.load %arg3[%c0_1, %c0_2] : memref<128x128xf32, #tpu.memory_space<vmem>>, vector<128x128xf32>
    %cst = arith.constant dense<0.000000e+00> : vector<8x128xf32>
    %2 = tpu.matmul %0, %1, %cst {dimension_numbers = #tpu.dot_dimension_numbers<[1], [0], [0], [1], [0, 0, 1, 1], [], []>} : vector<8x128xf32>, vector<128x128xf32>, vector<8x128xf32> -> vector<8x128xf32>
    %c0_3 = arith.constant 0 : index
    %c0_4 = arith.constant 0 : index
    %3 = vector.load %arg4[%c0_3, %c0_4] : memref<8x128xf32, #tpu.memory_space<vmem>>, vector<8x128xf32>
    tpu.vector_store %arg4[%c0_3, %c0_4], %2 {strides = array<i32>} : memref<8x128xf32, #tpu.memory_space<vmem>>, vector<8x128xf32>,
    return
  }
  func.func @transform_0(%arg0: i32, %arg1: i32) -> (i32, i32) {
    %c0_i32 = arith.constant 0 : i32
    %c0_i32_0 = arith.constant 0 : i32
    return %arg0, %c0_i32 : i32, i32
  }
  func.func @transform_1(%arg0: i32, %arg1: i32) -> (i32, i32) {
    %c0_i32 = arith.constant 0 : i32
    %c0_i32_0 = arith.constant 0 : i32
    return %c0_i32, %arg1 : i32, i32
  }
  func.func @transform_2(%arg0: i32, %arg1: i32) -> (i32, i32) {
    %c0_i32 = arith.constant 0 : i32
    return %arg0, %arg1 : i32, i32
  }
}

</mosaic_0001>

<bundles_post_ra>
// kernel: tpu_custom_call.1
= control target key start
LH: loop header
LB: loop body
LE: loop exit
PB: predicated region body
PF: predicated region fallthrough
CT: control target
= control target key end

     0   :  { %7 = vsyncpa [#allocation3], 0  ;;  %s210_s0 = inlined_call_operand.hbm [shape: f32[8,128], index: 0, kind: input, shape index: {}]   ;;  %s211_s1 = inlined_call_operand.hbm [shape: f32[128,128], index: 1, kind: input, shape index: {}]   ;;  %s212_s2 = inlined_call_operand.hbm [shape: f32[8,128], index: 2, kind: output, shape index: {}]  }
   0x1   :  { %8 = vsyncpa [#allocation6], 0 }
   0x2   :  { %9 = vsyncpa [#allocation4], 0  ;;  %s15_s11 = sshll.u32 %s210_s0, 4  ;;  %s181_s12 = smov [#allocation2]   ;;  %s16_s11 = int_to_ptr.hbm [resolvable:$true] %s15_s11 }
   0x3   :  { %s17_s13 = sshll.u32 %s181_s12, 4  ;;  %s25_s16 = sshll.u32 %s211_s1, 4  ;;  %s18_s13 = int_to_ptr.vmem [resolvable:$true] %s17_s13  ;;  %s26_s16 = int_to_ptr.hbm [resolvable:$true] %s25_s16 }
   0x4   :  { %20 = dma.hbm_to_vmem [thread:$0]  %s16_s11, 128, %s18_s13, [#allocation3]  }
   0x5   :  { %s182_s17 = smov [#allocation5]   ;;  %s183_s19 = smov 128  }
   0x6   :  { %s27_s18 = sshll.u32 %s182_s17, 4  ;;  %s184_s20 = smov 8   ;;  %s28_s18 = int_to_ptr.vmem [resolvable:$true] %s27_s18 }
   0x7   :  { %33 = dma.hbm_to_vmem [thread:$0]  %s26_s16, 2048, %s28_s18, [#allocation6], %s183_s19, %s183_s19, %s184_s20  }
   0x8   :  { %175 = dma.done.wait [#allocation3], 128  }
   0x9   :  { %176 = vsyncadd [#allocation3], 4294967168 }
   0xa   :  { %177 = dma.done.wait [#allocation6], 2048  }
   0xb   :  { %178 = vsyncadd [#allocation6], 4294965248  ;;  %v58_v0 = vld [vmem:[#allocation5 + $0x78] sm:$0xff]  ;;  %v57_v1 = vld [vmem:[#allocation5 + $0x70] sm:$0xff]  ;;  %s185_s0 = smov [#allocation7]   ;;  %s87_s23 = sshll.u32 %s212_s2, 4  ;;  %s88_s23 = int_to_ptr.hbm [resolvable:$true] %s87_s23 }
   0xc   :  { %59 = vmatpush.msra.mxu0 %v58_v0  ;;  %v56_v2 = vld [vmem:[#allocation5 + $0x68] sm:$0xff]  ;;  %v55_v3 = vld [vmem:[#allocation5 + $0x60] sm:$0xff]  ;;  %v54_v4 = vld [vmem:[#allocation5 + $0x58] sm:$0xff]  ;;  %s85_s1 = sshll.u32 %s185_s0, 4  ;;  %s86_s1 = int_to_ptr.vmem [resolvable:$true] %s85_s1 }
   0xd   :  { %v53_v5 = vld [vmem:[#allocation5 + $0x50] sm:$0xff]  ;;  %v52_v6 = vld [vmem:[#allocation5 + $0x48] sm:$0xff]  ;;  %v51_v7 = vld [vmem:[#allocation5 + $0x40] sm:$0xff] }
   0xe   :  { %60 = vmatpush.msra.mxu0 %v57_v1  ;;  %v50_v8 = vld [vmem:[#allocation5 + $0x38] sm:$0xff]  ;;  %v49_v9 = vld [vmem:[#allocation5 + $0x30] sm:$0xff]  ;;  %v48_v10 = vld [vmem:[#allocation5 + $0x28] sm:$0xff] }
   0xf   :  { %v47_v11 = vld [vmem:[#allocation5 + $0x20] sm:$0xff]  ;;  %v46_v12 = vld [vmem:[#allocation5 + $0x18] sm:$0xff]  ;;  %v45_v13 = vld [vmem:[#allocation5 + $0x10] sm:$0xff] }
  0x10   :  { %61 = vmatpush.msra.mxu0 %v56_v2  ;;  %v44_v14 = vld [vmem:[#allocation5 + $0x8] sm:$0xff]  ;;  %v43_v15 = vld [vmem:[#allocation5] sm:$0xff]  ;;  %v42_v16 = vld [vmem:[#allocation2] sm:$0xff] }
  0x12   :  { %62 = vmatpush.msra.mxu0 %v55_v3 }
  0x14   :  { %63 = vmatpush.msra.mxu0 %v54_v4 }
  0x16   :  { %64 = vmatpush.msra.mxu0 %v53_v5 }
  0x18   :  { %65 = vmatpush.msra.mxu0 %v52_v6 }
  0x1a   :  { %66 = vmatpush.msra.mxu0 %v51_v7 }
  0x1c   :  { %67 = vmatpush.msra.mxu0 %v50_v8 }
  0x1e   :  { %68 = vmatpush.msra.mxu0 %v49_v9 }
  0x20   :  { %69 = vmatpush.msra.mxu0 %v48_v10 }
  0x22   :  { %70 = vmatpush.msra.mxu0 %v47_v11 }
  0x24   :  { %71 = vmatpush.msra.mxu0 %v46_v12 }
  0x26   :  { %72 = vmatpush.msra.mxu0 %v45_v13 }
  0x28   :  { %73 = vmatpush.msra.mxu0 %v44_v14 }
  0x2a   :  { %74 = vmatpush.msra.mxu0 %v43_v15 }
  0x2b   :  { %75 = vmatmul.f32.vlgmr.msra.gmra.mxu0 %v42_v16 }
  0xa8   :  { %v76_v17 = vpop.f32.mrf.mxu0 }
  0xa9   :  { %79 = vst [vmem:[#allocation7] sm:$0xff] %v76_v17 }
  0xaa   :  { %90 = dma.vmem_to_hbm [thread:$0]  %s86_s1, 128, %s88_s23, [#allocation4]  }
  0xab   :  { %179 = dma.done.wait [#allocation4], 128  }
  0xac   :  { %180 = vsyncadd [#allocation4], 4294967168 }
  0xad   :  { %95 = vsyncpa [#allocation3], 1 }
  0xae   :  { %96 = vsyncpa [#allocation6], 1 }
  0xaf   :  { %97 = vsyncpa [#allocation4], 1 }

</bundles_post_ra>
